<compile_context>
chip_gen: v6e
topology: v6e:2x2x1
jax: 0.10.0
libtpu: 0.0.40
codegen_flags: <defaults>
</compile_context>

<pallas_src>
import functools

import jax
import jax.numpy as jnp
from jax.experimental import pallas as pl
from jax.experimental.pallas import tpu as pltpu


def _round_up(x, m):
    return (x + m - 1) // m * m


def _pconv_kernel(x_ref, m_ref, w_ref, vmask_ref, y_ref, nm_ref, stats_ref,
                  *, Wp):
    """Pass 1: partial conv + hole mask + BatchNorm partial statistics.

    x_ref, m_ref : (1, Cin, L)          bf16 halo-padded NCHW, spatial
                                        flattened to L = (H+2)*(W+2)+tail lanes
    w_ref        : (Cout+1, 9*(Cin+1))  bf16 tap-major columns; channel Cin of
                                        each tap = channel-reduced mask, row
                                        Cout = its all-ones "mask conv" row
    vmask_ref    : (1, N)               f32, 1.0 on real columns, 0.0 on the
                                        two per-row pad columns
    y_ref        : (1, Cout, N)         bf16 pre-BN output, lane-dense
    nm_ref       : (1, 1, N)            f32 new mask, lane-dense
    stats_ref    : (1, Cout, 2)         f32 [sum(y), sum(y*y)] per channel
    """
    N = y_ref.shape[2]
    Cout = y_ref.shape[1]

    x = x_ref[0]                                   # (Cin, L)
    m = m_ref[0]
    xm = x * m                                     # partial conv masks the input
    # Channel-reduced mask as one extra "channel": its 3x3 window sum (the
    # all-ones mask conv, no bias) falls out of the same MXU matmul as result
    # row Cout.  Exact in bf16 for Cin <= 256 (integer-valued 0/1 sums).
    mch = jnp.sum(m, axis=0, keepdims=True)        # (1, L)
    xa = jnp.concatenate([xm, mch], axis=0)        # (Cin+1, L)

    # im2col in the padded-flat space: each tap is a contiguous lane slice, so
    # no (H, W) -> (HW) data reshuffle is needed inside the kernel.
    pieces = []
    for ki in range(3):
        for kj in range(3):
            off = ki * Wp + kj
            pieces.append(xa[:, off:off + N])      # (Cin+1, N)
    cols = jnp.concatenate(pieces, axis=0)         # (9*(Cin+1), N), bf16

    # ONE fused MXU matmul; result is already (Cout[+1], N): no transpose.
    res = jnp.dot(w_ref[...], cols, preferred_element_type=jnp.float32)
    y = res[:Cout, :]                              # (Cout, N)
    msum = res[Cout:Cout + 1, :]                   # (1, N), exact integer sums

    hole = msum == 0.0                             # exact: integer-valued msum
    denom = jnp.where(hole, 1.0, msum)
    # (out - 0)/mask_sum + 0, holes -> 0, pad columns zeroed for the BN stats.
    # approx reciprocal (EUP) is ~2^-12 rel err, below the bf16 matmul noise.
    inv = jnp.where(hole, 0.0,
                    pl.reciprocal(denom, approx=True)) * vmask_ref[...]
    y = y * inv

    y_ref[0] = y.astype(y_ref.dtype)
    nm_ref[0] = jnp.where(hole, 0.0, 1.0).astype(nm_ref.dtype)

    # Pass-1 accumulators of the two-pass (global) BatchNorm, packed into one
    # tiny (Cout, 2) store instead of two 128-wide broadcast writes.
    s = jnp.sum(y, axis=-1, keepdims=True)         # (Cout, 1)
    sq = jnp.sum(y * y, axis=-1, keepdims=True)
    stats_ref[0] = jnp.concatenate([s, sq], axis=-1)


def _bn_relu_kernel(y_ref, scale_ref, shift_ref, o_ref):
    """Pass 2: global BatchNorm (gamma/beta folded into scale/shift) + ReLU."""
    W = o_ref.shape[-1]
    # Drop the two per-row pad columns on load; compute in f32.
    y = y_ref[...][..., :W].astype(jnp.float32)    # (Bt, Cout, H, W)
    scale = scale_ref[...][None, :, :, None]       # (1, Cout, 1, 1)
    shift = shift_ref[...][None, :, :, None]
    o_ref[...] = jnp.maximum(y * scale + shift, 0.0)


def partial_conv_layer(x, mask, weight, eps=1e-5):
    """x, mask: (B, Cin, H, W) NCHW float; weight: (Cout, Cin, 3, 3) torch layout.

    Returns (output, new_mask), both (B, Cout, H, W) float32, matching the
    PyTorch module's forward (training-mode BatchNorm batch statistics).
    """
    B, Cin, H, W = x.shape
    Cout = weight.shape[0]
    Hp, Wp = H + 2, W + 2
    N = H * Wp                                     # padded-flat output columns
    L = _round_up(Hp * Wp + 2, 128)                # +2: last tap slice overrun

    # Channel-major halo pad straight from NCHW (no transpose), flattened so
    # every tap is a contiguous lane slice in-kernel; bf16 MXU feed.
    def stage(a):
        a = jnp.pad(a.astype(jnp.bfloat16), ((0, 0), (0, 0), (1, 1), (1, 1)))
        a = a.reshape(B, Cin, Hp * Wp)
        return jnp.pad(a, ((0, 0), (0, 0), (0, L - Hp * Wp)))

    xp, mp = stage(x), stage(mask)

    # (Cout, Cin, 3, 3) -> (Cout+1, 9*(Cin+1)), tap-major columns, channel
    # minor within a tap.  Extra channel Cin is zero in the conv rows; extra
    # row Cout has ones on exactly those channels -> the all-ones mask conv
    # (sum_3x3 sum_c m) comes out of the same MXU matmul.
    wt = jnp.transpose(weight.astype(jnp.float32), (0, 2, 3, 1)).reshape(
        Cout, 9, Cin)
    wt = jnp.concatenate([wt, jnp.zeros((Cout, 9, 1), jnp.float32)], axis=-1)
    ones_row = jnp.concatenate(
        [jnp.zeros((1, 9, Cin), jnp.float32),
         jnp.ones((1, 9, 1), jnp.float32)], axis=-1)
    wf = jnp.concatenate([wt, ones_row], axis=0).reshape(
        Cout + 1, 9 * (Cin + 1)).astype(jnp.bfloat16)

    # 1.0 on real columns, 0.0 on the two per-row pad columns of the flat space.
    vmask = (jnp.arange(N, dtype=jnp.int32) % Wp < W).astype(
        jnp.float32).reshape(1, N)

    # TODO(synk): for production planes, tile H into halo'd row slabs
    # (grid=(B, H_slabs), manual DMA via pl.ANY + make_async_copy) so v7x's
    # 64 MiB physical / 32 MiB scoped VMEM holds the double-buffered blocks and
    # both TensorCores get several parallel steps; set vmem_limit_bytes then.
    y, nm, stats = pl.pallas_call(
        functools.partial(_pconv_kernel, Wp=Wp),
        grid=(B,),
        out_shape=(
            jax.ShapeDtypeStruct((B, Cout, N), jnp.bfloat16),
            jax.ShapeDtypeStruct((B, 1, N), jnp.float32),
            jax.ShapeDtypeStruct((B, Cout, 2), jnp.float32),
        ),
        in_specs=[
            pl.BlockSpec((1, Cin, L), lambda b: (b, 0, 0)),
            pl.BlockSpec((1, Cin, L), lambda b: (b, 0, 0)),
            pl.BlockSpec((Cout + 1, 9 * (Cin + 1)), lambda b: (0, 0)),
            pl.BlockSpec((1, N), lambda b: (0, 0)),
        ],
        out_specs=(
            pl.BlockSpec((1, Cout, N), lambda b: (b, 0, 0)),
            pl.BlockSpec((1, 1, N), lambda b: (b, 0, 0)),
            pl.BlockSpec((1, Cout, 2), lambda b: (b, 0, 0)),
        ),
        compiler_params=pltpu.CompilerParams(
            dimension_semantics=("parallel",)),
    )(xp, mp, wf, vmask)

    # Global (B, H, W) BatchNorm statistics from the tiny per-image partials
    # (gamma=1, beta=0, eps=1e-5, biased variance: fresh BatchNorm2d, training).
    cnt = jnp.float32(B * H * W)
    s = jnp.sum(stats[:, :, 0], axis=0)
    sq = jnp.sum(stats[:, :, 1], axis=0)
    mean = s / cnt
    var = jnp.maximum(sq / cnt - mean * mean, 0.0)
    scale = jax.lax.rsqrt(var + eps)
    shift = -mean * scale

    # Pass 2: big blocks (several/all batches per step) amortize the ~0.35us
    # per-grid-step overhead at small shapes; output is written directly NCHW.
    per_batch = Cout * (N * 2 + H * W * 4)
    bt = max(1, min(B, (2 << 20) // max(per_batch, 1)))
    while B % bt:
        bt -= 1
    out = pl.pallas_call(
        _bn_relu_kernel,
        grid=(B // bt,),
        out_shape=jax.ShapeDtypeStruct((B, Cout, H, W), jnp.float32),
        in_specs=[
            pl.BlockSpec((bt, Cout, H, Wp), lambda i: (i, 0, 0, 0)),
            pl.BlockSpec((Cout, 1), lambda i: (0, 0)),
            pl.BlockSpec((Cout, 1), lambda i: (0, 0)),
        ],
        out_specs=pl.BlockSpec((bt, Cout, H, W), lambda i: (i, 0, 0, 0)),
        compiler_params=pltpu.CompilerParams(
            dimension_semantics=("parallel",)),
    )(y.reshape(B, Cout, H, Wp), scale.reshape(Cout, 1), shift.reshape(Cout, 1))

    # new_mask: one hole channel broadcast over Cout (the all-ones mask conv is
    # identical for every output channel); pad columns sliced off here.
    nm = nm.reshape(B, 1, H, Wp)[:, :, :, :W]
    new_mask = jnp.broadcast_to(nm, (B, Cout, H, W))
    return out, new_mask


def init_input_conv_weight(key, in_channels, out_channels):
    """kaiming_normal_(a=0, mode='fan_in') equivalent, torch (Cout, Cin, 3, 3)."""
    fan_in = in_channels * 3 * 3
    std = (2.0 / fan_in) ** 0.5
    return std * jax.random.normal(
        key, (out_channels, in_channels, 3, 3), dtype=jnp.float32)


if __name__ == "__main__":
    B, Cin, Cout, H, W = 2, 4, 8, 16, 16

    key = jax.random.PRNGKey(0)
    k_x, k_m, k_w = jax.random.split(key, 3)

    x = jax.random.normal(k_x, (B, Cin, H, W), dtype=jnp.float32)
    # Binary hole mask, same shape as the input (as the torch module expects).
    mask = (jax.random.uniform(k_m, (B, Cin, H, W)) > 0.3).astype(jnp.float32)
    weight = init_input_conv_weight(k_w, Cin, Cout)

    out, new_mask = jax.jit(partial_conv_layer)(x, mask, weight)
    jax.block_until_ready((out, new_mask))

    assert out.shape == (B, Cout, H, W) and new_mask.shape == (B, Cout, H, W)
    print("KERNEL_OK")
</pallas_src>

<mosaic_0001>
module attributes {stable_mosaic.version = 11 : i64} {
  func.func @_pconv_kernel(%arg0: i32, %arg1: memref<1x4x384xbf16, #tpu.memory_space<vmem>>, %arg2: memref<1x4x384xbf16, #tpu.memory_space<vmem>>, %arg3: memref<9x45xbf16, #tpu.memory_space<vmem>>, %arg4: memref<1x288xf32, #tpu.memory_space<vmem>>, %arg5: memref<1x8x288xbf16, #tpu.memory_space<vmem>>, %arg6: memref<1x1x288xf32, #tpu.memory_space<vmem>>, %arg7: memref<1x8x2xf32, #tpu.memory_space<vmem>>) attributes {dimension_semantics = [#tpu.dimension_semantics<parallel>], iteration_bounds = array<i64: 2>, scalar_prefetch = 0 : i64, scratch_operands = 0 : i64, tpu.core_type = #tpu.core_type<tc>, window_params = [{transform_indices = @transform_0, window_bounds = array<i64: 1, 4, 384>}, {transform_indices = @transform_1, window_bounds = array<i64: 1, 4, 384>}, {pipeline_mode = #tpu.pipeline_mode<synchronous>, transform_indices = @transform_2, window_bounds = array<i64: 9, 45>}, {pipeline_mode = #tpu.pipeline_mode<synchronous>, transform_indices = @transform_3, window_bounds = array<i64: 1, 288>}, {transform_indices = @transform_4, window_bounds = array<i64: 1, 8, 288>}, {transform_indices = @transform_5, window_bounds = array<i64: 1, 1, 288>}, {transform_indices = @transform_6, window_bounds = array<i64: 1, 8, 2>}]} {
    %c0 = arith.constant 0 : index
    %c0_0 = arith.constant 0 : index
    %c0_1 = arith.constant 0 : index
    %0 = vector.load %arg1[%c0, %c0_0, %c0_1] : memref<1x4x384xbf16, #tpu.memory_space<vmem>>, vector<1x4x384xbf16>
    %1 = vector.shape_cast %0 : vector<1x4x384xbf16> to vector<4x384xbf16>
    %c0_2 = arith.constant 0 : index
    %c0_3 = arith.constant 0 : index
    %c0_4 = arith.constant 0 : index
    %2 = vector.load %arg2[%c0_2, %c0_3, %c0_4] : memref<1x4x384xbf16, #tpu.memory_space<vmem>>, vector<1x4x384xbf16>
    %3 = vector.shape_cast %2 : vector<1x4x384xbf16> to vector<4x384xbf16>
    %4 = arith.mulf %1, %3 : vector<4x384xbf16>
    %5 = arith.extf %3 : vector<4x384xbf16> to vector<4x384xf32>
    %cst = arith.constant dense<0.000000e+00> : vector<384xf32>
    %6 = vector.multi_reduction <add>, %5, %cst [0] : vector<4x384xf32> to vector<384xf32>
    %7 = vector.shape_cast %6 : vector<384xf32> to vector<1x384xf32>
    %8 = arith.truncf %7 : vector<1x384xf32> to vector<1x384xbf16>
    %9 = tpu.concatenate %4, %8 in 0 : vector<4x384xbf16>, vector<1x384xbf16> -> vector<5x384xbf16>
    %10 = vector.extract_strided_slice %9 {offsets = [0, 0], sizes = [5, 288], strides = [1, 1]} : vector<5x384xbf16> to vector<5x288xbf16>
    %11 = vector.extract_strided_slice %9 {offsets = [0, 1], sizes = [5, 288], strides = [1, 1]} : vector<5x384xbf16> to vector<5x288xbf16>
    %12 = vector.extract_strided_slice %9 {offsets = [0, 2], sizes = [5, 288], strides = [1, 1]} : vector<5x384xbf16> to vector<5x288xbf16>
    %13 = vector.extract_strided_slice %9 {offsets = [0, 18], sizes = [5, 288], strides = [1, 1]} : vector<5x384xbf16> to vector<5x288xbf16>
    %14 = vector.extract_strided_slice %9 {offsets = [0, 19], sizes = [5, 288], strides = [1, 1]} : vector<5x384xbf16> to vector<5x288xbf16>
    %15 = vector.extract_strided_slice %9 {offsets = [0, 20], sizes = [5, 288], strides = [1, 1]} : vector<5x384xbf16> to vector<5x288xbf16>
    %16 = vector.extract_strided_slice %9 {offsets = [0, 36], sizes = [5, 288], strides = [1, 1]} : vector<5x384xbf16> to vector<5x288xbf16>
    %17 = vector.extract_strided_slice %9 {offsets = [0, 37], sizes = [5, 288], strides = [1, 1]} : vector<5x384xbf16> to vector<5x288xbf16>
    %18 = vector.extract_strided_slice %9 {offsets = [0, 38], sizes = [5, 288], strides = [1, 1]} : vector<5x384xbf16> to vector<5x288xbf16>
    %19 = tpu.concatenate %10, %11, %12, %13, %14, %15, %16, %17, %18 in 0 : vector<5x288xbf16>, vector<5x288xbf16>, vector<5x288xbf16>, vector<5x288xbf16>, vector<5x288xbf16>, vector<5x288xbf16>, vector<5x288xbf16>, vector<5x288xbf16>, vector<5x288xbf16> -> vector<45x288xbf16>
    %c0_5 = arith.constant 0 : index
    %c0_6 = arith.constant 0 : index
    %20 = vector.load %arg3[%c0_5, %c0_6] : memref<9x45xbf16, #tpu.memory_space<vmem>>, vector<9x45xbf16>
    %cst_7 = arith.constant dense<0.000000e+00> : vector<9x288xf32>
    %21 = tpu.matmul %20, %19, %cst_7 {dimension_numbers = #tpu.dot_dimension_numbers<[1], [0], [0], [1], [0, 0, 1, 1], [], []>} : vector<9x45xbf16>, vector<45x288xbf16>, vector<9x288xf32> -> vector<9x288xf32>
    %22 = vector.extract_strided_slice %21 {offsets = [0, 0], sizes = [8, 288], strides = [1, 1]} : vector<9x288xf32> to vector<8x288xf32>
    %23 = vector.extract_strided_slice %21 {offsets = [8, 0], sizes = [1, 288], strides = [1, 1]} : vector<9x288xf32> to vector<1x288xf32>
    %cst_8 = arith.constant 0.000000e+00 : f32
    %24 = vector.broadcast %cst_8 : f32 to vector<1x288xf32>
    %25 = arith.cmpf oeq, %23, %24 : vector<1x288xf32>
    %cst_9 = arith.constant 1.000000e+00 : f32
    %26 = vector.broadcast %cst_9 : f32 to vector<1x288xf32>
    %27 = arith.select %25, %26, %23 : vector<1x288xi1>, vector<1x288xf32>
    %28 = tpu.reciprocal %27 {approx = true} : vector<1x288xf32> -> vector<1x288xf32>
    %cst_10 = arith.constant 0.000000e+00 : f32
    %29 = vector.broadcast %cst_10 : f32 to vector<1x288xf32>
    %30 = arith.select %25, %29, %28 : vector<1x288xi1>, vector<1x288xf32>
    %c0_11 = arith.constant 0 : index
    %c0_12 = arith.constant 0 : index
    %31 = vector.load %arg4[%c0_11, %c0_12] : memref<1x288xf32, #tpu.memory_space<vmem>>, vector<1x288xf32>
    %32 = arith.mulf %30, %31 : vector<1x288xf32>
    %33 = vector.broadcast %32 : vector<1x288xf32> to vector<8x288xf32>
    %34 = arith.mulf %22, %33 : vector<8x288xf32>
    %35 = arith.truncf %34 : vector<8x288xf32> to vector<8x288xbf16>
    %c0_13 = arith.constant 0 : index
    %c0_14 = arith.constant 0 : index
    %c0_15 = arith.constant 0 : index
    %36 = vector.load %arg5[%c0_13, %c0_14, %c0_15] : memref<1x8x288xbf16, #tpu.memory_space<vmem>>, vector<1x8x288xbf16>
    %37 = vector.shape_cast %36 : vector<1x8x288xbf16> to vector<8x288xbf16>
    %38 = vector.shape_cast %35 : vector<8x288xbf16> to vector<1x8x288xbf16>
    tpu.vector_store %arg5[%c0_13, %c0_14, %c0_15], %38 {strides = array<i32>} : memref<1x8x288xbf16, #tpu.memory_space<vmem>>, vector<1x8x288xbf16>,
    %cst_16 = arith.constant 0.000000e+00 : f32
    %cst_17 = arith.constant 1.000000e+00 : f32
    %39 = vector.broadcast %cst_16 : f32 to vector<1x288xf32>
    %40 = vector.broadcast %cst_17 : f32 to vector<1x288xf32>
    %41 = arith.select %25, %39, %40 : vector<1x288xi1>, vector<1x288xf32>
    %c0_18 = arith.constant 0 : index
    %c0_19 = arith.constant 0 : index
    %c0_20 = arith.constant 0 : index
    %42 = vector.load %arg6[%c0_18, %c0_19, %c0_20] : memref<1x1x288xf32, #tpu.memory_space<vmem>>, vector<1x1x288xf32>
    %43 = vector.shape_cast %42 : vector<1x1x288xf32> to vector<1x288xf32>
    %44 = vector.shape_cast %41 : vector<1x288xf32> to vector<1x1x288xf32>
    tpu.vector_store %arg6[%c0_18, %c0_19, %c0_20], %44 {strides = array<i32>} : memref<1x1x288xf32, #tpu.memory_space<vmem>>, vector<1x1x288xf32>,
    %cst_21 = arith.constant dense<0.000000e+00> : vector<8xf32>
    %45 = vector.multi_reduction <add>, %34, %cst_21 [1] : vector<8x288xf32> to vector<8xf32>
    %46 = vector.shape_cast %45 : vector<8xf32> to vector<8x1xf32>
    %47 = arith.mulf %34, %34 : vector<8x288xf32>
    %cst_22 = arith.constant dense<0.000000e+00> : vector<8xf32>
    %48 = vector.multi_reduction <add>, %47, %cst_22 [1] : vector<8x288xf32> to vector<8xf32>
    %49 = vector.shape_cast %48 : vector<8xf32> to vector<8x1xf32>
    %50 = tpu.concatenate %46, %49 in 1 : vector<8x1xf32>, vector<8x1xf32> -> vector<8x2xf32>
    %c0_23 = arith.constant 0 : index
    %c0_24 = arith.constant 0 : index
    %c0_25 = arith.constant 0 : index
    %51 = vector.load %arg7[%c0_23, %c0_24, %c0_25] : memref<1x8x2xf32, #tpu.memory_space<vmem>>, vector<1x8x2xf32>
    %52 = vector.shape_cast %51 : vector<1x8x2xf32> to vector<8x2xf32>
    %53 = vector.shape_cast %50 : vector<8x2xf32> to vector<1x8x2xf32>
    tpu.vector_store %arg7[%c0_23, %c0_24, %c0_25], %53 {strides = array<i32>} : memref<1x8x2xf32, #tpu.memory_space<vmem>>, vector<1x8x2xf32>,
    return
  }
  func.func @transform_0(%arg0: i32) -> (i32, i32, i32) {
    %c0_i32 = arith.constant 0 : i32
    %c0_i32_0 = arith.constant 0 : i32
    %c0_i32_1 = arith.constant 0 : i32
    return %arg0, %c0_i32, %c0_i32_0 : i32, i32, i32
  }
  func.func @transform_1(%arg0: i32) -> (i32, i32, i32) {
    %c0_i32 = arith.constant 0 : i32
    %c0_i32_0 = arith.constant 0 : i32
    %c0_i32_1 = arith.constant 0 : i32
    return %arg0, %c0_i32, %c0_i32_0 : i32, i32, i32
  }
  func.func @transform_2(%arg0: i32) -> (i32, i32) {
    %c0_i32 = arith.constant 0 : i32
    %c0_i32_0 = arith.constant 0 : i32
    %c0_i32_1 = arith.constant 0 : i32
    return %c0_i32, %c0_i32_0 : i32, i32
  }
  func.func @transform_3(%arg0: i32) -> (i32, i32) {
    %c0_i32 = arith.constant 0 : i32
    %c0_i32_0 = arith.constant 0 : i32
    %c0_i32_1 = arith.constant 0 : i32
    return %c0_i32, %c0_i32_0 : i32, i32
  }
  func.func @transform_4(%arg0: i32) -> (i32, i32, i32) {
    %c0_i32 = arith.constant 0 : i32
    %c0_i32_0 = arith.constant 0 : i32
    %c0_i32_1 = arith.constant 0 : i32
    return %arg0, %c0_i32, %c0_i32_0 : i32, i32, i32
  }
  func.func @transform_5(%arg0: i32) -> (i32, i32, i32) {
    %c0_i32 = arith.constant 0 : i32
    %c0_i32_0 = arith.constant 0 : i32
    %c0_i32_1 = arith.constant 0 : i32
    return %arg0, %c0_i32, %c0_i32_0 : i32, i32, i32
  }
  func.func @transform_6(%arg0: i32) -> (i32, i32, i32) {
    %c0_i32 = arith.constant 0 : i32
    %c0_i32_0 = arith.constant 0 : i32
    %c0_i32_1 = arith.constant 0 : i32
    return %arg0, %c0_i32, %c0_i32_0 : i32, i32, i32
  }
}

module attributes {stable_mosaic.version = 11 : i64} {
  func.func @_bn_relu_kernel(%arg0: i32, %arg1: memref<2x8x16x18xbf16, #tpu.memory_space<vmem>>, %arg2: memref<8x1xf32, #tpu.memory_space<vmem>>, %arg3: memref<8x1xf32, #tpu.memory_space<vmem>>, %arg4: memref<2x8x16x16xf32, #tpu.memory_space<vmem>>) attributes {dimension_semantics = [#tpu.dimension_semantics<parallel>], iteration_bounds = array<i64: 1>, scalar_prefetch = 0 : i64, scratch_operands = 0 : i64, tpu.core_type = #tpu.core_type<tc>, window_params = [{transform_indices = @transform_0, window_bounds = array<i64: 2, 8, 16, 18>}, {pipeline_mode = #tpu.pipeline_mode<synchronous>, transform_indices = @transform_1, window_bounds = array<i64: 8, 1>}, {pipeline_mode = #tpu.pipeline_mode<synchronous>, transform_indices = @transform_2, window_bounds = array<i64: 8, 1>}, {transform_indices = @transform_3, window_bounds = array<i64: 2, 8, 16, 16>}]} {
    %c0 = arith.constant 0 : index
    %c0_0 = arith.constant 0 : index
    %c0_1 = arith.constant 0 : index
    %c0_2 = arith.constant 0 : index
    %0 = vector.load %arg1[%c0, %c0_0, %c0_1, %c0_2] : memref<2x8x16x18xbf16, #tpu.memory_space<vmem>>, vector<2x8x16x18xbf16>
    %1 = vector.extract_strided_slice %0 {offsets = [0, 0, 0, 0], sizes = [2, 8, 16, 16], strides = [1, 1, 1, 1]} : vector<2x8x16x18xbf16> to vector<2x8x16x16xbf16>
    %2 = arith.extf %1 : vector<2x8x16x16xbf16> to vector<2x8x16x16xf32>
    %c0_3 = arith.constant 0 : index
    %c0_4 = arith.constant 0 : index
    %3 = vector.load %arg2[%c0_3, %c0_4] : memref<8x1xf32, #tpu.memory_space<vmem>>, vector<8x1xf32>
    %4 = vector.shape_cast %3 : vector<8x1xf32> to vector<1x8x1x1xf32>
    %c0_5 = arith.constant 0 : index
    %c0_6 = arith.constant 0 : index
    %5 = vector.load %arg3[%c0_5, %c0_6] : memref<8x1xf32, #tpu.memory_space<vmem>>, vector<8x1xf32>
    %6 = vector.shape_cast %5 : vector<8x1xf32> to vector<1x8x1x1xf32>
    %7 = vector.broadcast %4 : vector<1x8x1x1xf32> to vector<2x8x16x16xf32>
    %8 = arith.mulf %2, %7 : vector<2x8x16x16xf32>
    %9 = vector.broadcast %6 : vector<1x8x1x1xf32> to vector<2x8x16x16xf32>
    %10 = arith.addf %8, %9 : vector<2x8x16x16xf32>
    %cst = arith.constant 0.000000e+00 : f32
    %11 = vector.broadcast %cst : f32 to vector<2x8x16x16xf32>
    %12 = arith.maximumf %10, %11 : vector<2x8x16x16xf32>
    %c0_7 = arith.constant 0 : index
    %c0_8 = arith.constant 0 : index
    %c0_9 = arith.constant 0 : index
    %c0_10 = arith.constant 0 : index
    %13 = vector.load %arg4[%c0_7, %c0_8, %c0_9, %c0_10] : memref<2x8x16x16xf32, #tpu.memory_space<vmem>>, vector<2x8x16x16xf32>
    tpu.vector_store %arg4[%c0_7, %c0_8, %c0_9, %c0_10], %12 {strides = array<i32>} : memref<2x8x16x16xf32, #tpu.memory_space<vmem>>, vector<2x8x16x16xf32>,
    return
  }
  func.func @transform_0(%arg0: i32) -> (i32, i32, i32, i32) {
    %c0_i32 = arith.constant 0 : i32
    %c0_i32_0 = arith.constant 0 : i32
    %c0_i32_1 = arith.constant 0 : i32
    %c0_i32_2 = arith.constant 0 : i32
    return %arg0, %c0_i32, %c0_i32_0, %c0_i32_1 : i32, i32, i32, i32
  }
  func.func @transform_1(%arg0: i32) -> (i32, i32) {
    %c0_i32 = arith.constant 0 : i32
    %c0_i32_0 = arith.constant 0 : i32
    %c0_i32_1 = arith.constant 0 : i32
    return %c0_i32, %c0_i32_0 : i32, i32
  }
  func.func @transform_2(%arg0: i32) -> (i32, i32) {
    %c0_i32 = arith.constant 0 : i32
    %c0_i32_0 = arith.constant 0 : i32
    %c0_i32_1 = arith.constant 0 : i32
    return %c0_i32, %c0_i32_0 : i32, i32
  }
  func.func @transform_3(%arg0: i32) -> (i32, i32, i32, i32) {
    %c0_i32 = arith.constant 0 : i32
    %c0_i32_0 = arith.constant 0 : i32
    %c0_i32_1 = arith.constant 0 : i32
    %c0_i32_2 = arith.constant 0 : i32
    return %arg0, %c0_i32, %c0_i32_0, %c0_i32_1 : i32, i32, i32, i32
  }
}

</mosaic_0001>

<bundles_post_ra>
// kernel: mul.19
= control target key start
LH: loop header
LB: loop body
LE: loop exit
PB: predicated region body
PF: predicated region fallthrough
CT: control target
= control target key end

     0   :  { %s34_s0 = inlined_call_operand.vmem [shape: f32[8,1], index: 0, kind: input, shape index: {}]   ;;  %s35_s1 = inlined_call_operand.vmem [shape: f32[8,1], index: 1, kind: input, shape index: {}]   ;;  %s36_s2 = inlined_call_operand.vmem [shape: f32[8,1], index: 2, kind: output, shape index: {}]  }
   0x1   :  { %v3_v0 = vld [vmem:[%s34_s0] sm:$0xff] }
   0x2   :  { %v4_v1 = vld [vmem:[%s35_s1] sm:$0xff] }
   0x3   :  { %v7_v2 = vmul.f32 %v4_v1, %v3_v0 }
   0x5   :  { %9 = vst [vmem:[%s36_s2] sm:$0xff] %v7_v2 }

// kernel: partial_conv_layer.3
= control target key start
LH: loop header
LB: loop body
LE: loop exit
PB: predicated region body
PF: predicated region fallthrough
CT: control target
= control target key end

     0   :  { %v85_v0 = vlaneseq  ;;  %v564_v1 = vmov 0   ;;  %v565_v2 = vmov 1966171168   ;;  %s778_s0 = inlined_call_operand.vmem [shape: bf16[2,8,16,18], index: 0, kind: input, shape index: {}]   ;;  %s779_s1 = inlined_call_operand.vmem [shape: f32[8,1], index: 1, kind: input, shape index: {}]   ;;  %s780_s2 = inlined_call_operand.vmem [shape: f32[8,1], index: 2, kind: input, shape index: {}]   ;;  %s781_s3 = inlined_call_operand.hbm [shape: f32[2,8,16,16], index: 3, kind: output, shape index: {}]  }
   0x1   :  { %538 = vset.pattern.permute.xlu0 %v564_v1  ;;  %v83_v3 = vunpack.c.l.s4 %v565_v2  ;;  %539 = vset.pattern.permute.xlu1 %v564_v1 }
   0x2   :  { %8 = vsyncpa [#allocation3], 0  ;;  %v79_v4 = vld [vmem:[%s779_s1] sm:$0xff]  ;;  %v86_v5 = vshrl.u32 %v85_v0, 7  ;;  %v608_v54 = vld [vmem:[%s778_s0 + $0x10] sm:$0xff]   ;;  %vm405_vm0 = vcmask 130048  }
   0x3   :  { %v84_v6 = vunpack.c.0.s8 %v83_v3  ;;  %v81_v7 = vcombine.high %v79_v4, %v79_v4  ;;  %v130_v8 = vld [vmem:[%s780_s2] sm:$0xff]  ;;  %v615_v56 = vld [vmem:[%s778_s0 + $0x50] sm:$0xff]   ;;  %v631_v60 = vld [vmem:[%s778_s0 + $0x28] sm:$0xff]   ;;  %v464_v1 = vunpack.c.l.bf16 %v608_v54 }
   0x4   :  { %v183_v11 = vsub.s32 0, %v86_v5  ;;  %v132_v31 = vcombine.high %v130_v8, %v130_v8  ;;  %v598_v52 = vld [vmem:[%s778_s0] sm:$0xff]   ;;  %v518_v2 = vld [vmem:[%s778_s0 + $0x8] sm:$0xff]  }
   0x5   :  { %v87_v9 = vsub.s32 %v84_v6, %v86_v5  ;;  %v603_v53 = vld [vmem:[%s778_s0 + $0x40] sm:$0xff]   ;;  %v456_v58 = vunpack.c.l.bf16 %v598_v52  ;;  %v457_v61 = vunpack.c.h.bf16 %v598_v52  ;;  %v526_v3 = vld [vmem:[%s778_s0 + $0x48] sm:$0xff]   ;;  %v496_v5 = vunpack.c.l.bf16 %v615_v56 }
   0x6   :  { %v620_v57 = vld [vmem:[%s778_s0 + $0x20] sm:$0xff]   ;;  %v488_v62 = vunpack.c.l.bf16 %v603_v53  ;;  %v489_v63 = vunpack.c.h.bf16 %v603_v53  ;;  %v497_v6 = vunpack.c.h.bf16 %v615_v56 }
   0x7   :  { %v88_v10 = vrot.slane %v79_v4, %v87_v9  ;;  %v95_v12 = vrot.slane %v81_v7, %v87_v9  ;;  %v139_v13 = vrot.slane %v130_v8, %v87_v9  ;;  %v146_v36 = vrot.slane %v132_v31, %v87_v9  ;;  %v626_v59 = vld [vmem:[%s778_s0 + $0x60] sm:$0xff]   ;;  %v652_v8 = vld [vmem:[%s778_s0 + $0x68] sm:$0xff]   ;;  %v693_v31 = vld [vmem:[%s778_s0 + $0x78] sm:$0xff]  }
   0x8   :  { %v465_v4 = vunpack.c.h.bf16 %v608_v54  ;;  %v472_v7 = vunpack.c.l.bf16 %v620_v57 }
   0x9   :  { %v104_v14 = vrot.slane %v88_v10, %v87_v9  ;;  %v96_v15 = vcombine.high %v88_v10, %v88_v10  ;;  %v111_v16 = vrot.slane %v95_v12, %v87_v9  ;;  %v97_v17 = vcombine.high %v95_v12, %v95_v12 }
   0xa   :  { %v147_v21 = vcombine.high %v139_v13, %v139_v13  ;;  %v155_v33 = vrot.slane %v139_v13, %v87_v9  ;;  %v148_v41 = vcombine.high %v146_v36, %v146_v36  ;;  %v162_v43 = vrot.slane %v146_v36, %v87_v9 }
   0xb   :  { %v184_v18 = vrot.slane %v104_v14, %v183_v11  ;;  %v126_v19 = vcombine.high %v104_v14, %v104_v14  ;;  %v125_v20 = vrot.slane %v97_v17, %v87_v9  ;;  %v200_v23 = vrot.slane %v111_v16, %v183_v11  ;;  %v661_v14 = vld [vmem:[%s778_s0 + $0x18] sm:$0xff]  }
   0xc   :  { %v118_v24 = vrot.slane %v96_v15, %v87_v9  ;;  %v169_v26 = vrot.slane %v147_v21, %v87_v9  ;;  %v127_v28 = vcombine.high %v111_v16, %v111_v16  ;;  %v280_v37 = vrot.slane %v155_v33, %v183_v11  ;;  %v666_v15 = vld [vmem:[%s778_s0 + $0x58] sm:$0xff]   ;;  %v676_v21 = vld [vmem:[%s778_s0 + $0x70] sm:$0xff]  }
   0xd   :  { %214 = vperm.xlu0 %538, %v184_v18   ;;  %v192_v22 = vrot.slane %v126_v19, %v183_v11  ;;  %v204_v25 = vrot.slane %v125_v20, %v183_v11  ;;  %v129_v35 = vcombine.high %v125_v20, %v125_v20  ;;  %v177_v38 = vcombine.high %v155_v33, %v155_v33  ;;  %v671_v20 = vld [vmem:[%s778_s0 + $0x30] sm:$0xff]  }
   0xe   :  { %v188_v27 = vrot.slane %v118_v24, %v183_v11  ;;  %v284_v29 = vrot.slane %v169_v26, %v183_v11  ;;  %v128_v30 = vcombine.high %v118_v24, %v118_v24  ;;  %v208_v32 = vrot.slane %v127_v28, %v183_v11 }
   0xf   :  { %222 = vperm.xlu1 %539, %v192_v22   ;;  %v212_v39 = vrot.slane %v129_v35, %v183_v11  ;;  %v179_v40 = vcombine.high %v169_v26, %v169_v26  ;;  %v288_v42 = vrot.slane %v177_v38, %v183_v11  ;;  %v176_v45 = vrot.slane %v148_v41, %v87_v9 }
  0x10   :  { %v196_v34 = vrot.slane %v128_v30, %v183_v11  ;;  %v296_v46 = vrot.slane %v162_v43, %v183_v11  ;;  %v178_v47 = vcombine.high %v162_v43, %v162_v43  ;;  %v473_v10 = vunpack.c.h.bf16 %v620_v57  ;;  %v688_v30 = vld [vmem:[%s778_s0 + $0x38] sm:$0xff]   ;;  %s566_s0 = smov [#allocation2]  }
  0x11   :  { %230 = vperm.xlu0 %538, %v200_v23   ;;  %v292_v44 = vrot.slane %v179_v40, %v183_v11  ;;  %v300_v48 = vrot.slane %v176_v45, %v183_v11  ;;  %v180_v49 = vcombine.high %v176_v45, %v176_v45  ;;  %v505_v12 = vunpack.c.h.bf16 %v626_v59  ;;  %s443_s17 = sshll.u32 %s566_s0, 4  ;;  %s444_s17 = int_to_ptr.vmem [resolvable:$true] %s443_s17 }
  0x12   :  { %v304_v50 = vrot.slane %v178_v47, %v183_v11  ;;  %v476_v13 = vunpack.c.l.bf16 %v631_v60  ;;  %v460_v16 = vunpack.c.l.bf16 %v518_v2  ;;  %v461_v17 = vunpack.c.h.bf16 %v518_v2  ;;  %s542_s18 = scalar_lea.vmem %s444_s17, 4096  ;;  %p547_p1 = scmp.lt.s32.totalorder %s444_s17, %s444_s17 }
  0x13   :  { %234 = vperm.xlu1 %539, %v204_v25   ;;  %v308_v51 = vrot.slane %v180_v49, %v183_v11  ;;  %v504_v11 = vunpack.c.l.bf16 %v626_v59  ;;  %v492_v18 = vunpack.c.l.bf16 %v526_v3  ;;  %v493_v19 = vunpack.c.h.bf16 %v526_v3  ;;  %p543_p0 = scmp.ne.s32.totalorder %s444_s17, %s542_s18  ;;  %p548_p2 = scmp.lt.s32.totalorder %s542_s18, %s542_s18 }
  0x14   :  { %v477_v23 = vunpack.c.h.bf16 %v631_v60  ;;  %v508_v24 = vunpack.c.l.bf16 %v652_v8  ;;  %v509_v25 = vunpack.c.h.bf16 %v652_v8  ;;  %v468_v26 = vunpack.c.l.bf16 %v661_v14 }
  0x15   :  { %218 = vperm.xlu0 %538, %v188_v27   ;;  %v469_v27 = vunpack.c.h.bf16 %v661_v14  ;;  %v500_v28 = vunpack.c.l.bf16 %v666_v15  ;;  %v480_v33 = vunpack.c.l.bf16 %v671_v20  ;;  %v512_v35 = vunpack.c.l.bf16 %v676_v21  ;;  %p549_p3 = por %p548_p2, %p547_p1 }
  0x16   :  { %v513_v36 = vunpack.c.h.bf16 %v676_v21  ;;  %v485_v43 = vunpack.c.h.bf16 %v688_v30  ;;  %v517_v45 = vunpack.c.h.bf16 %v693_v31 }
  0x17   :  { %314 = vperm.xlu1 %539, %v284_v29   ;;  %v501_v29 = vunpack.c.h.bf16 %v666_v15  ;;  %p550_p4 = pnand %p549_p3, %p543_p0 }
  0x19   :  { %238 = vperm.xlu0 %538, %v208_v32  }
  0x1b   :  { %226 = vperm.xlu1 %539, %v196_v34   ;;  %v481_v34 = vunpack.c.h.bf16 %v671_v20 }
  0x1d   :  { %310 = vperm.xlu0 %538, %v280_v37  }
  0x1f   :  { %242 = vperm.xlu1 %539, %v212_v39  }
  0x21   :  { %318 = vperm.xlu0 %538, %v288_v42   ;;  %v484_v42 = vunpack.c.l.bf16 %v688_v30 }
  0x23   :  { %322 = vperm.xlu1 %539, %v292_v44   ;;  %v516_v44 = vunpack.c.l.bf16 %v693_v31 }
  0x25   :  { %326 = vperm.xlu0 %538, %v296_v46  }
  0x27   :  { %330 = vperm.xlu1 %539, %v300_v48  }
  0x29   :  { %334 = vperm.xlu0 %538, %v304_v50  }
  0x2b   :  { %338 = vperm.xlu1 %539, %v308_v51  }
  0x88   :  { %v610_v55 = vpop.permute.xlu0 %214 }
  0x89   :  { %v245_v50 = vmul.f32 %v456_v58, %v610_v55  ;;  %v246_v51 = vmul.f32 %v457_v61, %v610_v55  ;;  %v261_v52 = vmul.f32 %v488_v62, %v610_v55  ;;  %v262_v53 = vmul.f32 %v489_v63, %v610_v55 }
  0x8a   :  { %v636_v0 = vpop.permute.xlu1 %222 }
  0x8b   :  { %v249_v2 = vmul.f32 %v464_v1, %v636_v0  ;;  %v250_v3 = vmul.f32 %v465_v4, %v636_v0  ;;  %v265_v8 = vmul.f32 %v496_v5, %v636_v0 }
  0x8c   :  { %v231_v9 = vpop.permute.xlu0 %230 }
  0x8d   :  { %v254_v61 = vmul.f32 %v473_v10, %v231_v9  ;;  %v270_v62 = vmul.f32 %v505_v12, %v231_v9 }
  0x8e   :  { %v235_v22 = vpop.permute.xlu1 %234 }
  0x8f   :  { %v715_v55 = vmul.f32 %v476_v13, %v235_v22  ;;  %v717_v63 = vmul.f32 %v477_v23, %v235_v22  ;;  %v719_v1 = vmul.f32 %v508_v24, %v235_v22 }
  0x90   :  { %v219_v32 = vpop.permute.xlu0 %218 }
  0x91   :  { %v247_v37 = vmul.f32 %v460_v16, %v219_v32  ;;  %v248_v38 = vmul.f32 %v461_v17, %v219_v32  ;;  %v263_v39 = vmul.f32 %v492_v18, %v219_v32  ;;  %v264_v40 = vmul.f32 %v493_v19, %v219_v32 }
  0x92   :  { %v315_v41 = vpop.permute.xlu1 %314  ;;  %v266_v16 = vmul.f32 %v497_v6, %v636_v0  ;;  %v253_v17 = vmul.f32 %v472_v7, %v231_v9  ;;  %v269_v18 = vmul.f32 %v504_v11, %v231_v9  ;;  %v721_v0 = vmul.f32 %v509_v25, %v235_v22 }
  0x93   :  { %v343_v46 = vadd.f32 %v315_v41, %v247_v37  ;;  %v344_v47 = vadd.f32 %v315_v41, %v248_v38  ;;  %v359_v48 = vadd.f32 %v315_v41, %v263_v39  ;;  %v360_v49 = vadd.f32 %v315_v41, %v264_v40 }
  0x94   :  { %v239_v54 = vpop.permute.xlu0 %238 }
  0x95   :  { %v375_v56 = vmax.f32 %v343_v46, 0.0  ;;  %v376_v57 = vmax.f32 %v344_v47, 0.0  ;;  %v391_v59 = vmax.f32 %v359_v48, 0.0  ;;  %v392_v60 = vmax.f32 %v360_v49, 0.0 }
  0x96   :  { %v227_v58 = vpop.permute.xlu1 %226  ;;  %v723_v11 = vmul.f32 %v480_v33, %v239_v54  ;;  %v725_v12 = vmul.f32 %v481_v34, %v239_v54  ;;  %v727_v19 = vmul.f32 %v512_v35, %v239_v54  ;;  %v729_v13 = vmul.f32 %v513_v36, %v239_v54 }
  0x97   :  { %408 = vst.msk [vmem:[#allocation2 + $0x10] sm:$0xff] %vm405_vm0, %v375_v56  ;;  %409 = vst.msk [vmem:[#allocation2 + $0x18] sm:$0xff] %vm405_vm0, %v376_v57  ;;  %v251_v22 = vmul.f32 %v468_v26, %v227_v58  ;;  %v252_v25 = vmul.f32 %v469_v27, %v227_v58  ;;  %v267_v30 = vmul.f32 %v500_v28, %v227_v58 }
  0x98   :  { %424 = vst.msk [vmem:[#allocation2 + $0x90] sm:$0xff] %vm405_vm0, %v391_v59  ;;  %425 = vst.msk [vmem:[#allocation2 + $0x98] sm:$0xff] %vm405_vm0, %v392_v60  ;;  %v311_v4 = vpop.permute.xlu0 %310  ;;  %v268_v31 = vmul.f32 %v501_v29, %v227_v58 }
  0x99   :  { %v341_v5 = vadd.f32 %v311_v4, %v245_v50  ;;  %v342_v6 = vadd.f32 %v311_v4, %v246_v51  ;;  %v357_v7 = vadd.f32 %v311_v4, %v261_v52  ;;  %v358_v9 = vadd.f32 %v311_v4, %v262_v53 }
  0x9a   :  { %v243_v10 = vpop.permute.xlu1 %242 }
  0x9b   :  { %v373_v20 = vmax.f32 %v341_v5, 0.0  ;;  %v374_v21 = vmax.f32 %v342_v6, 0.0  ;;  %v389_v23 = vmax.f32 %v357_v7, 0.0  ;;  %v390_v24 = vmax.f32 %v358_v9, 0.0 }
  0x9c   :  { %v319_v32 = vpop.permute.xlu0 %318  ;;  %v259_v35 = vmul.f32 %v484_v42, %v243_v10  ;;  %v260_v36 = vmul.f32 %v485_v43, %v243_v10  ;;  %v275_v28 = vmul.f32 %v516_v44, %v243_v10  ;;  %v276_v37 = vmul.f32 %v517_v45, %v243_v10 }
  0x9d   :  { %406 = vst.msk [vmem:[#allocation2] sm:$0xff] %vm405_vm0, %v373_v20  ;;  %407 = vst.msk [vmem:[#allocation2 + $0x8] sm:$0xff] %vm405_vm0, %v374_v21  ;;  %v345_v33 = vadd.f32 %v319_v32, %v249_v2  ;;  %v346_v26 = vadd.f32 %v319_v32, %v250_v3  ;;  %v361_v34 = vadd.f32 %v319_v32, %v265_v8 }
  0x9e   :  { %422 = vst.msk [vmem:[#allocation2 + $0x80] sm:$0xff] %vm405_vm0, %v389_v23  ;;  %423 = vst.msk [vmem:[#allocation2 + $0x88] sm:$0xff] %vm405_vm0, %v390_v24  ;;  %v362_v14 = vadd.f32 %v319_v32, %v266_v16  ;;  %v323_v27 = vpop.permute.xlu1 %322 }
  0x9f   :  { %v377_v15 = vmax.f32 %v345_v33, 0.0  ;;  %v378_v29 = vmax.f32 %v346_v26, 0.0  ;;  %v393_v38 = vmax.f32 %v361_v34, 0.0  ;;  %v347_v40 = vadd.f32 %v323_v27, %v251_v22 }
  0xa0   :  { %v394_v39 = vmax.f32 %v362_v14, 0.0  ;;  %v348_v41 = vadd.f32 %v323_v27, %v252_v25  ;;  %v363_v46 = vadd.f32 %v323_v27, %v267_v30  ;;  %v364_v47 = vadd.f32 %v323_v27, %v268_v31  ;;  %v327_v48 = vpop.permute.xlu0 %326 }
  0xa1   :  { %410 = vst.msk [vmem:[#allocation2 + $0x20] sm:$0xff] %vm405_vm0, %v377_v15  ;;  %411 = vst.msk [vmem:[#allocation2 + $0x28] sm:$0xff] %vm405_vm0, %v378_v29  ;;  %v349_v42 = vadd.f32 %v327_v48, %v253_v17  ;;  %v350_v43 = vadd.f32 %v327_v48, %v254_v61  ;;  %v365_v44 = vadd.f32 %v327_v48, %v269_v18  ;;  %v379_v49 = vmax.f32 %v347_v40, 0.0 }
  0xa2   :  { %426 = vst.msk [vmem:[#allocation2 + $0xa0] sm:$0xff] %vm405_vm0, %v393_v38  ;;  %427 = vst.msk [vmem:[#allocation2 + $0xa8] sm:$0xff] %vm405_vm0, %v394_v39  ;;  %v366_v45 = vadd.f32 %v327_v48, %v270_v62  ;;  %v380_v50 = vmax.f32 %v348_v41, 0.0  ;;  %v395_v51 = vmax.f32 %v363_v46, 0.0  ;;  %v396_v52 = vmax.f32 %v364_v47, 0.0  ;;  %v331_v53 = vpop.permute.xlu1 %330 }
  0xa3   :  { %v381_v54 = vmax.f32 %v349_v42, 0.0  ;;  %v382_v56 = vmax.f32 %v350_v43, 0.0  ;;  %v397_v57 = vmax.f32 %v365_v44, 0.0  ;;  %412 = vst.msk [vmem:[#allocation2 + $0x30] sm:$0xff] %vm405_vm0, %v379_v49  ;;  %v351_v60 = vadd.f32 %v331_v53, %v715_v55 }
  0xa4   :  { %v398_v59 = vmax.f32 %v366_v45, 0.0  ;;  %413 = vst.msk [vmem:[#allocation2 + $0x38] sm:$0xff] %vm405_vm0, %v380_v50  ;;  %428 = vst.msk [vmem:[#allocation2 + $0xb0] sm:$0xff] %vm405_vm0, %v395_v51  ;;  %v352_v2 = vadd.f32 %v331_v53, %v717_v63  ;;  %v367_v3 = vadd.f32 %v331_v53, %v719_v1  ;;  %v368_v8 = vadd.f32 %v331_v53, %v721_v0  ;;  %v335_v16 = vpop.permute.xlu0 %334 }
  0xa5   :  { %429 = vst.msk [vmem:[#allocation2 + $0xb8] sm:$0xff] %vm405_vm0, %v396_v52  ;;  %414 = vst.msk [vmem:[#allocation2 + $0x40] sm:$0xff] %vm405_vm0, %v381_v54  ;;  %v353_v58 = vadd.f32 %v335_v16, %v723_v11  ;;  %v354_v17 = vadd.f32 %v335_v16, %v725_v12  ;;  %v369_v61 = vadd.f32 %v335_v16, %v727_v19  ;;  %v383_v62 = vmax.f32 %v351_v60, 0.0 }
  0xa6   :  { %415 = vst.msk [vmem:[#allocation2 + $0x48] sm:$0xff] %vm405_vm0, %v382_v56  ;;  %430 = vst.msk [vmem:[#allocation2 + $0xc0] sm:$0xff] %vm405_vm0, %v397_v57  ;;  %v370_v18 = vadd.f32 %v335_v16, %v729_v13  ;;  %v384_v55 = vmax.f32 %v352_v2, 0.0  ;;  %v399_v63 = vmax.f32 %v367_v3, 0.0  ;;  %v400_v1 = vmax.f32 %v368_v8, 0.0  ;;  %v339_v0 = vpop.permute.xlu1 %338 }
  0xa7   :  { %431 = vst.msk [vmem:[#allocation2 + $0xc8] sm:$0xff] %vm405_vm0, %v398_v59  ;;  %v385_v4 = vmax.f32 %v353_v58, 0.0  ;;  %v386_v5 = vmax.f32 %v354_v17, 0.0  ;;  %v401_v6 = vmax.f32 %v369_v61, 0.0  ;;  %416 = vst.msk [vmem:[#allocation2 + $0x50] sm:$0xff] %vm405_vm0, %v383_v62  ;;  %v355_v9 = vadd.f32 %v339_v0, %v259_v35 }
  0xa8   :  { %v402_v7 = vmax.f32 %v370_v18, 0.0  ;;  %417 = vst.msk [vmem:[#allocation2 + $0x58] sm:$0xff] %vm405_vm0, %v384_v55  ;;  %432 = vst.msk [vmem:[#allocation2 + $0xd0] sm:$0xff] %vm405_vm0, %v399_v63  ;;  %v356_v10 = vadd.f32 %v339_v0, %v260_v36  ;;  %v371_v11 = vadd.f32 %v339_v0, %v275_v28  ;;  %v372_v12 = vadd.f32 %v339_v0, %v276_v37 }
  0xa9   :  { %433 = vst.msk [vmem:[#allocation2 + $0xd8] sm:$0xff] %vm405_vm0, %v400_v1  ;;  %418 = vst.msk [vmem:[#allocation2 + $0x60] sm:$0xff] %vm405_vm0, %v385_v4  ;;  %v387_v19 = vmax.f32 %v355_v9, 0.0 }
  0xaa   :  { %419 = vst.msk [vmem:[#allocation2 + $0x68] sm:$0xff] %vm405_vm0, %v386_v5  ;;  %434 = vst.msk [vmem:[#allocation2 + $0xe0] sm:$0xff] %vm405_vm0, %v401_v6  ;;  %v388_v13 = vmax.f32 %v356_v10, 0.0  ;;  %v403_v20 = vmax.f32 %v371_v11, 0.0  ;;  %v404_v21 = vmax.f32 %v372_v12, 0.0 }
  0xab   :  { %435 = vst.msk [vmem:[#allocation2 + $0xe8] sm:$0xff] %vm405_vm0, %v402_v7  ;;  %420 = vst.msk [vmem:[#allocation2 + $0x70] sm:$0xff] %vm405_vm0, %v387_v19 }
  0xac   :  { %421 = vst.msk [vmem:[#allocation2 + $0x78] sm:$0xff] %vm405_vm0, %v388_v13  ;;  %436 = vst.msk [vmem:[#allocation2 + $0xf0] sm:$0xff] %vm405_vm0, %v403_v20 }
  0xad   :  { %437 = vst.msk [vmem:[#allocation2 + $0xf8] sm:$0xff] %vm405_vm0, %v404_v21 }
  0xae   :  { %553 = shalt.err (!%p550_p4)
}
  0xaf   :  { %s567_s19 = smov 128   ;;  %s568_s20 = smov 8  }
  0xb0   :  { %449 = dma.vmem_to_hbm [thread:$0]  %s444_s17, 4096, %s781_s3, [#allocation3], %s567_s19, %s567_s19, %s568_s20  }
  0xb1   :  { %562 = dma.done.wait [#allocation3], 4096  }
  0xb2   :  { %563 = vsyncadd [#allocation3], 4294963200 }
  0xb3   :  { %453 = vsyncpa [#allocation3], 1 }

// kernel: partial_conv_layer.2
= control target key start
LH: loop header
LB: loop body
LE: loop exit
PB: predicated region body
PF: predicated region fallthrough
CT: control target
= control target key end

     0   :  { %s1060_s21 = smov 0   ;;  %s1255_s0 = inlined_call_operand.vmem [shape: bf16[2,4,384], index: 0, kind: input, shape index: {}]   ;;  %s1256_s1 = inlined_call_operand.vmem [shape: bf16[2,4,384], index: 1, kind: input, shape index: {}]   ;;  %s1257_s2 = inlined_call_operand.vmem [shape: bf16[9,45], index: 2, kind: input, shape index: {}]   ;;  %s1258_s3 = inlined_call_operand.vmem [shape: f32[1,288], index: 3, kind: input, shape index: {}]   ;;  %s1259_s4 = inlined_call_operand.vmem [shape: bf16[2,8,288], index: 4, kind: output, shape index: {0}]   ;;  %s1260_s5 = inlined_call_operand.vmem [shape: f32[2,1,288], index: 5, kind: output, shape index: {1}]   ;;  %s1261_s6 = inlined_call_operand.vmem [shape: f32[2,8,2], index: 6, kind: output, shape index: {2}]  }
   0x1 LB: > { %s932_s22 = sadd.s32 4294967295, %s1008_s21   ;;  %p936_p0 = scmp.ge.s32.totalorder %s1008_s21, 1  ;;  %s1008_s21 = sphi %s1060_s21, %s17_s21  }
   0x2   : > { %p227_p1 = scmp.lt.s32.totalorder %s1008_s21, 3 }
   0x4   : > { %p228_p2 = pnand %p936_p0, %p227_p1 }
   0x5   : > { %p270_p3 = scmp.lt.s32.totalorder (!%p228_p2), %s932_s22, 1  ;;  %s1012_s30 = smov (!%p228_p2), 90  }
   0x6   : > { %231 = sbr.rel (%p228_p2) target bundleno = 575 (0x23f), region = 36  ;;  %s1013_s7 = smov (!%p228_p2), 92  }
   0x7   : > { %s1014_s8 = smov (!%p228_p2), 109   ;;  %s1015_s9 = smov (!%p228_p2), 91  }
   0x8   : > { %s1016_s10 = smov (!%p228_p2), 110   ;;  %s1017_s11 = smov (!%p228_p2), 108  }
   0x9   : > { %s1018_s12 = smov (!%p228_p2), 127   ;;  %s1019_s13 = smov (!%p228_p2), 126  }
   0xb   : > { %s1271_s22 = smov (!%p270_p3, %s932_s22), 1  ;;  %vm302_vm0 = vcmask 1043456   ;;  %v332_v3 = vlaneseq  ;;  %v1010_v4 = vmov 1983009808   ;;  %vm344_vm1 = vcmask 1041408  }
   0xc   : > { %s964_s23 = smul.u32 6, %s1271_s22  ;;  %v330_v5 = vunpack.c.l.s4 %v1010_v4  ;;  %v1011_v39 = vmov 0.0   ;;  %vm1020_vm2 = vmmov 0   ;;  %vm594_vm3 = vcmask 1045504   ;;  %s940_s28 = sshll.u32 %s1271_s22, 3 }
   0xd   : > { %v1080_v11 = vshrl.u32 %v332_v3, 7  ;;  %954 = vmatprep.subr.bf16.mxu1 %v1011_v39  ;;  %960 = vmatprep.mubr.msk.bf16.mxu1 %vm1020_vm2, %v1011_v39  ;;  %vm569_vm4 = vsmask.f32 1280  ;;  %vm555_vm5 = vcmask 1046528   ;;  %vm473_vm7 = vcmask 752640   ;;  %s966_s16 = smul.u32 3, %s1271_s22 }
   0xe   : > { %s279_s26 = scalar_lea.vmem %s1256_s1, %s964_s23  ;;  %s274_s29 = scalar_lea.vmem %s1255_s0, %s964_s23  ;;  %v331_v16 = vunpack.c.0.s8 %v330_v5  ;;  %vm1154_vm6 = vmand %vm344_vm1, %vm569_vm4  ;;  %vm509_vm8 = vcmask 736256   ;;  %vm494_vm9 = vcmask 744448   ;;  %vm423_vm10 = vcmask 900096  }
   0xf   : > { %v295_v0 = vld [vmem:[%s279_s26] sm:$0x3f]  ;;  %vm518_vm11 = vcmask 1044480   ;;  %vm550_vm12 = vsmask.f32 4352  ;;  %vm440_vm13 = vcmask 891904   ;;  %s288_s23 = scalar_lea.vmem %s1260_s5, %s966_s16 }
  0x10   : > { %v297_v1 = vunpack.c.l.bf16 %v295_v0  ;;  %v298_v2 = vunpack.c.h.bf16 %v295_v0  ;;  %v294_v6 = vld [vmem:[%s274_s29] sm:$0x3f]  ;;  %v334_v24 = vsub.s32 %v331_v16, %v1080_v11  ;;  %vm458_vm14 = vcmask 883712   ;;  %vm1174_vm15 = vmand %vm518_vm11, %vm550_vm12  ;;  %s965_s24 = smul.u32 12, %s1271_s22 }
  0x11   : > { %v296_v14 = vmul.bf16 %v295_v0, %v294_v6  ;;  %vm513_vm2 = vsmask.f32 2304  ;;  %vm531_vm4 = vcmask 1047552   ;;  %vm782_vm12 = vcmp.lt.s32.totalorder %v332_v3, 288 }
  0x12   : > { %v317_v7 = vsel %vm302_vm0, %v298_v2, 0.0  ;;  %v300_v8 = vcombine.high %v297_v1, %v297_v1  ;;  %v303_v10 = vsel %vm302_vm0, %v297_v1, 0.0  ;;  %s284_s27 = scalar_lea.vmem %s1259_s4, %s965_s24 }
  0x13   : > { %v318_v9 = vrot.slane %v317_v7, 4  ;;  %v304_v13 = vrot.slane %v303_v10, 4  ;;  %v328_v23 = vcombine.high %v296_v14, %v296_v14  ;;  %v335_v28 = vrot.slane %v296_v14, %v334_v24 }
  0x14   : > { %v310_v12 = vsel %vm302_vm0, %v300_v8, 0.0 }
  0x15   : > { %v319_v15 = vadd.f32 %v318_v9, %v317_v7  ;;  %v311_v17 = vrot.slane %v310_v12, 4  ;;  %v305_v18 = vadd.f32 %v304_v13, %v303_v10  ;;  %v342_v32 = vrot.slane %v328_v23, %v334_v24 }
  0x16   : > { %v343_v37 = vcombine.high %v335_v28, %v335_v28 }
  0x17   : > { %v320_v19 = vrot.slane %v319_v15, 2  ;;  %v312_v20 = vadd.f32 %v311_v17, %v310_v12  ;;  %v306_v21 = vrot.slane %v305_v18, 2 }
  0x19   : > { %v321_v22 = vadd.f32 %v320_v19, %v319_v15  ;;  %v313_v25 = vrot.slane %v312_v20, 2  ;;  %v307_v26 = vadd.f32 %v306_v21, %v305_v18 }
  0x1b   : > { %v322_v27 = vrot.slane %v321_v22, 1  ;;  %v314_v29 = vadd.f32 %v313_v25, %v312_v20  ;;  %v308_v30 = vrot.slane %v307_v26, 1 }
  0x1d   : > { %v323_v31 = vadd.f32 %v322_v27, %v321_v22  ;;  %v315_v33 = vrot.slane %v314_v29, 1  ;;  %v309_v34 = vadd.f32 %v308_v30, %v307_v26 }
  0x1f   : > { %v326_v35 = vpack.c.bf16 %v323_v31, %v323_v31  ;;  %v316_v36 = vadd.f32 %v315_v33, %v314_v29  ;;  %v324_v38 = vpack.c.bf16 %v309_v34, %v309_v34  ;;  %v1021_v33 = vmov 0  }
  0x20   : > { %635 = vmatprep.mubr.bf16.mxu0 %v1021_v33 }
  0x21   : > { %v1086_v40 = vsel %vm344_vm1, %v342_v32, %v326_v35  ;;  %v325_v41 = vpack.c.bf16 %v316_v36, %v316_v36  ;;  %v1091_v44 = vsel %vm344_vm1, %v335_v28, %v324_v38 }
  0x22   : > { %v502_v42 = vrot.slane %v1086_v40, 4  ;;  %v466_v43 = vrot.slane %v1086_v40, 1  ;;  %v1094_v45 = vshrl.u32 %v1086_v40, 16  ;;  %v1100_v47 = vshll.u32 %v1086_v40, 16 }
  0x23   : > { %v1097_v46 = vsel %vm344_vm1, %v343_v37, %v325_v41  ;;  %v464_v49 = vrot.slane %v1091_v44, 1  ;;  %v1108_v51 = vshrl.u32 %v1091_v44, 16  ;;  %v1112_v53 = vshll.u32 %v1091_v44, 16 }
  0x24   : > { %507 = vrot.lane.b32.xlu1 %v502_v42, %s1012_s30  ;;  %471 = vrot.lane.b32.xlu0 %v466_v43, %s1013_s7  ;;  %v432_v48 = vrot.slane %v1097_v46, 6  ;;  %v485_v50 = vrot.slane %v1094_v45, 6  ;;  %v486_v52 = vrot.slane %v1100_v47, 7  ;;  %v500_v54 = vrot.slane %v1091_v44, 4 }
  0x25   : > { %v479_v56 = vrot.slane %v1108_v51, 6  ;;  %v480_v57 = vrot.slane %v1112_v53, 7  ;;  %v433_v58 = vrot.slane %v1086_v40, 6  ;;  %v405_v60 = vrot.slane %v1112_v53, 1 }
  0x26   : > { %v487_v55 = vor.u32 %v486_v52, %v485_v50  ;;  %v431_v61 = vrot.slane %v1091_v44, 6  ;;  %v443_v62 = vrot.slane %v1108_v51, 3  ;;  %v444_v0 = vrot.slane %v1112_v53, 4 }
  0x27   : > { %v481_v59 = vor.u32 %v480_v57, %v479_v56  ;;  %v408_v63 = vor.u32 %v405_v60, %v1108_v51  ;;  %v364_v1 = vshrl.u32 %v1097_v46, 16  ;;  %v367_v2 = vshll.u32 %v1097_v46, 16 }
  0x28   : > { %436 = vrot.lane.b32.xlu1 %v432_v48, %s1014_s8  ;;  %467 = vrot.lane.b32.xlu0 %v464_v49, %s1013_s7  ;;  %v465_v4 = vrot.slane %v1097_v46, 1  ;;  %v445_v5 = vor.u32 %v444_v0, %v443_v62  ;;  %v501_v8 = vrot.slane %v1097_v46, 4  ;;  %v407_v12 = vrot.slane %v1100_v47, 1 }
  0x29   : > { %v482_v6 = vrot.slane %v364_v1, 6  ;;  %v483_v7 = vrot.slane %v367_v2, 7  ;;  %v406_v10 = vrot.slane %v367_v2, 1  ;;  %v446_v13 = vrot.slane %v364_v1, 3 }
  0x2a   : > { %v449_v14 = vrot.slane %v1094_v45, 3  ;;  %v410_v16 = vor.u32 %v407_v12, %v1094_v45  ;;  %v447_v17 = vrot.slane %v367_v2, 4  ;;  %v450_v18 = vrot.slane %v1100_v47, 4 }
  0x2b   : > { %v484_v9 = vor.u32 %v483_v7, %v482_v6  ;;  %v409_v15 = vor.u32 %v406_v10, %v364_v1  ;;  %v366_v19 = vrot.slane %v364_v1, 5  ;;  %v369_v20 = vrot.slane %v367_v2, 6 }
  0x2c   : > { %503 = vrot.lane.b32.xlu0 %v500_v54, %s1012_s30  ;;  %492 = vrot.lane.b32.xlu1 %v487_v55, %s1015_s9  ;;  %v448_v21 = vor.u32 %v447_v17, %v446_v13  ;;  %v451_v22 = vor.u32 %v450_v18, %v449_v14  ;;  %v373_v23 = vrot.slane %v1094_v45, 5  ;;  %v376_v24 = vrot.slane %v1100_v47, 6 }
  0x2d   : > { %v370_v25 = vor.u32 %v369_v20, %v366_v19  ;;  %v359_v27 = vrot.slane %v1108_v51, 5  ;;  %v362_v28 = vrot.slane %v1112_v53, 6  ;;  %v394_v30 = vrot.slane %v1097_v46, 3 }
  0x2e   : > { %v377_v26 = vor.u32 %v376_v24, %v373_v23  ;;  %v395_v31 = vrot.slane %v1086_v40, 3  ;;  %v393_v32 = vrot.slane %v1091_v44, 3  ;;  %v990_v34 = vpack.i.bf16 %v407_v12, %v406_v10 }
  0x2f   : > { %v363_v29 = vor.u32 %v362_v28, %v359_v27  ;;  %v1022_v41 = vmov 65535  }
  0x30   : > { %438 = vrot.lane.b32.xlu0 %v433_v58, %s1014_s8  ;;  %488 = vrot.lane.b32.xlu1 %v481_v59, %s1015_s9  ;;  %v595_v42 = vsel %vm594_vm3, 4294967295, %v1022_v41  ;;  %vm402_vm3 = vcmask 1031168  }
  0x31   : > { %v596_v48 = vsel %vm555_vm5, %v595_v42, 0 }
  0x34   : > { %434 = vrot.lane.b32.xlu0 %v431_v61, %s1014_s8  ;;  %417 = vrot.lane.b32.xlu1 %v408_v63, %s1016_s10 }
  0x38   : > { %469 = vrot.lane.b32.xlu0 %v465_v4, %s1013_s7  ;;  %452 = vrot.lane.b32.xlu1 %v445_v5, %s1017_s11  ;;  %s292_s7 = scalar_lea.vmem %s1261_s6, %s940_s28 }
  0x3c   : > { %505 = vrot.lane.b32.xlu0 %v501_v8, %s1012_s30  ;;  %490 = vrot.lane.b32.xlu1 %v484_v9, %s1015_s9 }
  0x40   : > { %419 = vrot.lane.b32.xlu1 %v409_v15, %s1016_s10  ;;  %421 = vrot.lane.b32.xlu0 %v410_v16, %s1016_s10 }
  0x44   : > { %454 = vrot.lane.b32.xlu1 %v448_v21, %s1017_s11  ;;  %456 = vrot.lane.b32.xlu0 %v451_v22, %s1017_s11 }
  0x48   : > { %380 = vrot.lane.b32.xlu0 %v370_v25, %s1018_s12  ;;  %382 = vrot.lane.b32.xlu1 %v377_v26, %s1018_s12 }
  0x4c   : > { %378 = vrot.lane.b32.xlu0 %v363_v29, %s1018_s12  ;;  %398 = vrot.lane.b32.xlu1 %v394_v30, %s1019_s13 }
  0x50   : > { %400 = vrot.lane.b32.xlu0 %v395_v31, %s1019_s13  ;;  %396 = vrot.lane.b32.xlu1 %v393_v32, %s1019_s13 }
  0x54   : > { %991 = vrot.lane.b32.xlu0 %v990_v34, %s1016_s10  ;;  %411 = vrot.lane.b32.xlu1 %v405_v60, %s1016_s10 }
  0x96   : > { %v508_v35 = vpop.permute.xlu1 %507  ;;  %v1151_v36 = vpop.permute.xlu0 %471 }
  0x9a   : > { %v437_v37 = vpop.permute.xlu1 %436  ;;  %v468_v38 = vpop.permute.xlu0 %467 }
  0x9e   : > { %v504_v45 = vpop.permute.xlu0 %503  ;;  %v493_v47 = vpop.permute.xlu1 %492 }
  0x9f   : > { %v573_v49 = vsel %vm1154_vm6, %v1151_v36, %v493_v47 }
  0xa0   : > { %v582_v50 = vsel %vm302_vm0, %v573_v49, %v508_v35 }
  0xa1   : > { %v601_v51 = vand.u32 %v596_v48, %v582_v50 }
  0xa2   : > { %v439_v52 = vpop.permute.xlu0 %438  ;;  %v489_v53 = vpop.permute.xlu1 %488 }
  0xa3   : > { %955 = vmatpush3.bf16.msra.mxu1 %v601_v51  ;;  %v442_v16 = vsel %vm440_vm13, %v437_v37, %v439_v52 }
  0xa4   : > { %956 = vmatprep.subr.bf16.mxu1 %v1011_v39 }
  0xa6   : > { %v435_v54 = vpop.permute.xlu0 %434  ;;  %v418_v55 = vpop.permute.xlu1 %417 }
  0xa7   : > { %v441_v15 = vsel %vm440_vm13, %v435_v54, %v437_v37  ;;  %vm748_vm13 = vcmask 257024  }
  0xaa   : > { %v470_v56 = vpop.permute.xlu0 %469  ;;  %v453_v57 = vpop.permute.xlu1 %452 }
  0xab   : > { %v474_v58 = vsel %vm473_vm7, %v468_v38, %v470_v56  ;;  %v475_v59 = vsel %vm473_vm7, %v470_v56, %v1151_v36 }
  0xae   : > { %v506_v60 = vpop.permute.xlu0 %505  ;;  %v491_v61 = vpop.permute.xlu1 %490 }
  0xaf   : > { %v510_v62 = vsel %vm509_vm8, %v504_v45, %v506_v60  ;;  %v511_v63 = vsel %vm509_vm8, %v506_v60, %v508_v35  ;;  %v495_v0 = vsel %vm494_vm9, %v489_v53, %v491_v61  ;;  %v496_v1 = vsel %vm494_vm9, %v491_v61, %v493_v47 }
  0xb0   : > { %v571_v2 = vsel %vm1154_vm6, %v474_v58, %v495_v0  ;;  %v572_v4 = vsel %vm1154_vm6, %v475_v59, %v496_v1  ;;  %vm532_vm6 = vsmask.f32 7424  ;;  %vm590_vm8 = vcmask 367616  }
  0xb1   : > { %v579_v5 = vsel %vm302_vm0, %v572_v4, %v511_v63  ;;  %v576_v6 = vsel %vm302_vm0, %v571_v2, %v510_v62  ;;  %vm384_vm0 = vcmask 1039360  }
  0xb2   : > { %v420_v7 = vpop.permute.xlu1 %419  ;;  %v422_v8 = vpop.permute.xlu0 %421  ;;  %v599_v9 = vand.u32 %v596_v48, %v579_v5  ;;  %v597_v10 = vand.u32 %v596_v48, %v576_v6 }
  0xb3   : > { %v426_v12 = vsel %vm423_vm10, %v418_v55, %v420_v7  ;;  %v427_v13 = vsel %vm423_vm10, %v420_v7, %v422_v8  ;;  %v547_v18 = vsel %vm344_vm1, %v422_v8, %v439_v52 }
  0xb4   : > { %613 = vmatprep.subr.bf16.mxu0 %v599_v9  ;;  %v539_v17 = vsel %vm344_vm1, %v426_v12, %v441_v15  ;;  %v543_v21 = vsel %vm344_vm1, %v427_v13, %v442_v16  ;;  %vm512_vm1 = vcmask 1042432   ;;  %v1024_v9 = vmov 1.0  }
  0xb5   : > { %614 = vmatpush1.bf16.msra.mxu0 %v597_v10  ;;  %vm1192_vm7 = vmand %vm512_vm1, %vm513_vm2 }
  0xb6   : > { %v455_v19 = vpop.permute.xlu1 %454  ;;  %v457_v20 = vpop.permute.xlu0 %456 }
  0xb7   : > { %v459_v22 = vsel %vm458_vm14, %v453_v57, %v455_v19  ;;  %v460_v23 = vsel %vm458_vm14, %v455_v19, %v457_v20  ;;  %v554_v24 = vsel %vm1174_vm15, %v547_v18, %v457_v20  ;;  %v711_v18 = vsub.s32 2, %v1080_v11  ;;  %v699_v19 = vld [vmem:[%s1258_s3] sm:$0x7] }
  0xb8   : > { %v566_v25 = vsel %vm555_vm5, %v554_v24, %v1151_v36  ;;  %v553_v26 = vsel %vm1174_vm15, %v543_v21, %v460_v23  ;;  %v552_v27 = vsel %vm1174_vm15, %v539_v17, %v459_v22  ;;  %v703_v21 = vsub.s32 0, %v1080_v11 }
  0xb9   : > { %957 = vmatpush3.bf16.msra.mxu1 %v566_v25  ;;  %v562_v28 = vsel %vm555_vm5, %v553_v26, %v475_v59  ;;  %v558_v29 = vsel %vm555_vm5, %v552_v27, %v474_v58  ;;  %vm1196_vm5 = vmand %vm531_vm4, %vm532_vm6  ;;  %v1023_v59 = vmov 1966171168   ;;  %v712_v23 = vrot.slane %v699_v19, %v711_v18 }
  0xba   : > { %615 = vmatprep.subr.bf16.mxu0 %v562_v28  ;;  %v381_v30 = vpop.permute.xlu0 %380  ;;  %v383_v31 = vpop.permute.xlu1 %382  ;;  %958 = vmatprep.subr.bf16.mxu1 %v1011_v39  ;;  %v758_v60 = vunpack.c.l.s4 %v1023_v59  ;;  %v707_v24 = vsub.s32 1, %v1080_v11  ;;  %v704_v26 = vrot.slane %v699_v19, %v703_v21  ;;  %vm786_vm14 = vcmask 261120  }
  0xbb   : > { %616 = vmatpush1.bf16.msra.mxu0 %v558_v29  ;;  %v386_v37 = vsel %vm384_vm0, %v381_v30, %v383_v31  ;;  %v517_v48 = vsel %vm1192_vm7, %v1086_v40, %v383_v31  ;;  %v995_v40 = vld [vmem:[%s1257_s2] sm:$0x1f]   ;;  %vm799_vm15 = vcmask 7168  }
  0xbc   : > { %v516_v47 = vsel %vm1192_vm7, %v1097_v46, %v386_v37  ;;  %v759_v1 = vunpack.c.0.s8 %v758_v60 }
  0xbe   : > { %v379_v32 = vpop.permute.xlu0 %378  ;;  %v399_v33 = vpop.permute.xlu1 %398  ;;  %v762_v8 = vsub.s32 %v759_v1, %v1080_v11 }
  0xbf   : > { %v385_v38 = vsel %vm384_vm0, %v379_v32, %v381_v30  ;;  %v708_v30 = vrot.slane %v699_v19, %v707_v24  ;;  %vm801_vm0 = vcmask 15360  }
  0xc0   : > { %v515_v51 = vsel %vm1192_vm7, %v1091_v44, %v385_v38 }
  0xc2   : > { %v401_v34 = vpop.permute.xlu0 %400  ;;  %v397_v35 = vpop.permute.xlu1 %396 }
  0xc3   : > { %v404_v41 = vsel %vm402_vm3, %v399_v33, %v401_v34  ;;  %v403_v42 = vsel %vm402_vm3, %v397_v35, %v399_v33  ;;  %v529_v52 = vsel %vm518_vm11, %v517_v48, %v401_v34 }
  0xc4   : > { %v525_v53 = vsel %vm518_vm11, %v516_v47, %v404_v41  ;;  %v521_v56 = vsel %vm518_vm11, %v515_v51, %v403_v42 }
  0xc6   : > { %v992_v39 = vpop.permute.xlu0 %991  ;;  %v412_v43 = vpop.permute.xlu1 %411 }
  0xc7   : > { %v994_v49 = vunpack.i.h.bf16 %v992_v39  ;;  %v993_v50 = vunpack.i.l.bf16 %v992_v39 }
  0xc9   : > { %v424_v54 = vsel %vm423_vm10, %v412_v43, %v993_v50  ;;  %v536_v55 = vsel %vm1196_vm5, %v529_v52, %v994_v49  ;;  %v425_v46 = vsel %vm423_vm10, %v993_v50, %v994_v49 }
  0xca   : > { %959 = vmatpush3.bf16.msra.mxu1 %v536_v55  ;;  %v535_v44 = vsel %vm1196_vm5, %v525_v53, %v425_v46  ;;  %v534_v57 = vsel %vm1196_vm5, %v521_v56, %v424_v54 }
  0xcb   : > { %617 = vmatprep.subr.bf16.mxu0 %v535_v44 }
  0xcc   : > { %618 = vmatpush1.bf16.msra.mxu0 %v534_v57 }
  0xcd   : > { %961 = vmatmul.mubr.msk.bf16.vlgmr.msra.gmra.mxu1 %vm590_vm8, %v995_v40 }
  0xcf   : > { %942 = vmatmul.mubr.msk.bf16.vlgmr.msra.gmra.mxu0 %vm590_vm8, %v995_v40 }
 0x18d   : > { %v680_v58 = vpop.f32.mrf.mxu1 }
 0x18f   : > { %v637_v61 = vpop.f32.mrf.mxu0  ;;  %v962_v62 = vpop.f32.mrf.mxu1 }
 0x191   : > { %v639_v63 = vpop.f32.mrf.mxu0  ;;  %v683_v0 = vpop.f32.mrf.mxu1 }
 0x192   : > { %vm689_vm9 = vcmp.eq.f32.partialorder %v683_v0, 0.0 }
 0x193   : > { %v692_v2 = vsel %vm689_vm9, 1.0, %v683_v0  ;;  %v641_v4 = vpop.f32.mrf.mxu0  ;;  %v963_v5 = vpop.f32.mrf.mxu1  ;;  %v752_v10 = vsel %vm689_vm9, 0.0, %v1024_v9 }
 0x194   : > { %996 = vrcp.f32 %v692_v2  ;;  %vm687_vm10 = vcmp.eq.f32.partialorder %v641_v4, 0.0  ;;  %v770_v16 = vrot.slane %v752_v10, %v762_v8 }
 0x195   : > { %v690_v6 = vsel %vm687_vm10, 1.0, %v641_v4  ;;  %v643_v7 = vpop.f32.mrf.mxu0  ;;  %v750_v12 = vsel %vm687_vm10, 0.0, %v1024_v9 }
 0x196   : > { %998 = vrcp.f32 %v690_v6  ;;  %vm688_vm11 = vcmp.eq.f32.partialorder %v643_v7, 0.0 }
 0x197   : > { %v691_v13 = vsel %vm688_vm11, 1.0, %v643_v7  ;;  %v751_v14 = vsel %vm688_vm11, 0.0, %v1024_v9 }
 0x198   : > { %1000 = vrcp.f32 %v691_v13  ;;  %v756_v15 = vcombine.low %v750_v12, %v751_v14 }
 0x19a   : > { %v763_v17 = vrot.slane %v756_v15, %v762_v8 }
 0x19c   : > { %v771_v20 = vcombine.low %v763_v17, %v770_v16 }
 0x19e   : > { %v778_v22 = vrot.slane %v771_v20, %v762_v8 }
 0x1a0   : > { %784 = vst.msk [vmem:[%s288_s23] sm:$0x7] %vm782_vm12, %v778_v22 }
 0x1a1   : > { %v997_v25 = vpop.eup %996 }
 0x1a2   : > { %v698_v27 = vsel %vm689_vm9, 0.0, %v997_v25 }
 0x1a3   : > { %v999_v28 = vpop.eup %998  ;;  %v718_v29 = vmul.f32 %v712_v23, %v698_v27 }
 0x1a4   : > { %v696_v31 = vsel %vm687_vm10, 0.0, %v999_v28 }
 0x1a5   : > { %v1001_v32 = vpop.eup %1000  ;;  %v730_v33 = vrot.slane %v718_v29, %v703_v21  ;;  %v716_v34 = vmul.f32 %v704_v26, %v696_v31 }
 0x1a6   : > { %v697_v3 = vsel %vm688_vm11, 0.0, %v1001_v32 }
 0x1a7   : > { %v722_v35 = vrot.slane %v716_v34, %v703_v21  ;;  %v717_v36 = vmul.f32 %v708_v30, %v697_v3  ;;  %v733_v37 = vmul.f32 %v730_v33, %v680_v58 }
 0x1a9   : > { %v726_v11 = vrot.slane %v717_v36, %v703_v21  ;;  %v731_v38 = vmul.f32 %v722_v35, %v637_v61  ;;  %v949_v41 = vpack.c.bf16 %v733_v37, %v733_v37  ;;  %v793_v39 = vmul.f32 %v733_v37, %v733_v37 }
 0x1aa   : > { %v787_v49 = vsel %vm786_vm14, %v733_v37, 0.0 }
 0x1ab   : > { %v732_v42 = vmul.f32 %v726_v11, %v639_v63  ;;  %749 = vst.msk [vmem:[%s284_s27 + $0x8] sm:$0xf] %vm748_vm13, %v949_v41  ;;  %v791_v47 = vmul.f32 %v731_v38, %v731_v38  ;;  %v795_v52 = vsel %vm786_vm14, %v793_v39, 0.0 }
 0x1ad   : > { %v785_v43 = vadd.f32 %v732_v42, %v731_v38  ;;  %v948_v45 = vpack.c.bf16 %v732_v42, %v731_v38  ;;  %v792_v48 = vmul.f32 %v732_v42, %v732_v42 }
 0x1af   : > { %v788_v50 = vadd.f32 %v787_v49, %v785_v43  ;;  %747 = vst [vmem:[%s284_s27] sm:$0xff] %v948_v45  ;;  %v794_v51 = vadd.f32 %v792_v48, %v791_v47 }
 0x1b1   : > { %789 = vadd.xlane.f32.xlu0 %v788_v50  ;;  %v796_v53 = vadd.f32 %v795_v52, %v794_v51 }
 0x1b3   : > { %797 = vadd.xlane.f32.xlu1 %v796_v53 }
 0x23a   : > { %v790_v54 = vpop.xlane.xlu0 %789 }
 0x23c   : > { %v798_v55 = vpop.xlane.xlu1 %797 }
 0x23d   : > { %v800_v46 = vsel %vm799_vm15, %v790_v54, %v798_v55 }
 0x23e   : > { %802 = vst.msk [vmem:[%s292_s7] sm:$0xff] %vm801_vm0, %v800_v46 }
 0x23f PF: > { %s17_s21 = sadd.s32 1, %s1008_s21  }
 0x240   : > { %p14_p4 = scmp.ge.s32.totalorder %s17_s21, 4  }
 0x242   :  { %16 = sbr.rel (!%p14_p4) target bundleno = 1 (0x1), region = 93 }

</bundles_post_ra>
